<compile_context>
chip_gen: v7x
topology: tpu7x:2x2x1
jax: 0.10.0
libtpu: 0.0.40
codegen_flags: <defaults>
</compile_context>

<pallas_src>
import jax
import jax.numpy as jnp
from jax.experimental import pallas as pl
from jax.experimental.pallas import tpu as pltpu


def _round_up(n, m):
    return ((n + m - 1) // m) * m


def policy_kernel(x_ref, w1_ref, b1_ref, w2t_ref, b2_ref, o_ref):
    """One batch tile: Linear -> ReLU -> Linear -> LogSoftmax, all f32.

    x_ref  : (tb, S)   un-padded input features
    w1_ref : (S, Hp)   layer-1 weight, hidden dim zero-padded to 128 lanes
    b1_ref : (1, Hp)
    w2t_ref: (A, Hp)   layer-2 weight, (out, in) layout, in-dim padded
    b2_ref : (1, A)
    o_ref  : (tb, A)   un-padded log-probs
    """
    _, S = x_ref.shape
    A = o_ref.shape[1]

    x = x_ref[...]                                 # (tb, S), S tiny (e.g. 4)
    w1 = w1_ref[...]                               # (S, Hp)

    # ---- Layer 1 on the VPU: broadcast-MAC over the S features (K is tiny,
    # so this avoids a degenerate K=4 MXU matmul entirely).
    acc = x[:, 0:1] * w1[0:1, :]                   # (tb, Hp)
    for s in range(1, S):                          # static unroll
        acc = acc + x[:, s:s + 1] * w1[s:s + 1, :]
    h = jnp.maximum(acc + b1_ref[...], 0.0)        # bias + ReLU; pad cols stay 0

    # ---- Layer 2 + numerically stable log-softmax over the A real actions:
    # one lane-reduction (XLU) per action column, exp/log only on real lanes.
    w2t = w2t_ref[...]                             # (A, Hp)
    b2 = b2_ref[...]                               # (1, A)
    z_cols = []
    for a in range(A):                             # static unroll (A=2)
        za = jnp.sum(h * w2t[a:a + 1, :], axis=-1, keepdims=True)   # (tb, 1)
        z_cols.append(za + b2[:, a:a + 1])
    m = z_cols[0]
    for a in range(1, A):
        m = jnp.maximum(m, z_cols[a])
    den = jnp.exp(z_cols[0] - m)
    for a in range(1, A):
        den = den + jnp.exp(z_cols[a] - m)
    lse = jnp.log(den) + m
    for a in range(A):
        o_ref[:, a:a + 1] = (z_cols[a] - lse).astype(o_ref.dtype)


def prepare_params(w1, b1, w2, b2, lane=128):
    """Pad parameters once at init (not per call).

    w1: (S, H), b1: (H,), w2: (H, A), b2: (A,).  Only the hidden dim is padded
    to the 128-lane width; S and A stay un-padded so no extra HBM bytes move
    for x or the output.
    """
    S, H = w1.shape
    H2, A = w2.shape
    assert H == H2
    Hp = _round_up(H, lane)
    w1_p = jnp.zeros((S, Hp), jnp.float32).at[:, :H].set(w1.astype(jnp.float32))
    b1_p = jnp.zeros((1, Hp), jnp.float32).at[:, :H].set(
        jnp.reshape(b1, (1, H)).astype(jnp.float32))
    w2t_p = jnp.zeros((A, Hp), jnp.float32).at[:, :H].set(
        w2.T.astype(jnp.float32))
    b2_p = jnp.reshape(b2, (1, A)).astype(jnp.float32)
    return (w1_p, b1_p, w2t_p, b2_p)


def policy_forward(x, params, *, tb_max=1024):
    """log_softmax(relu(x @ w1 + b1) @ w2 + b2, axis=1) via a Pallas kernel."""
    w1_p, b1_p, w2t_p, b2_p = params
    B, S = x.shape
    Hp = w1_p.shape[1]
    A = w2t_p.shape[0]

    # Pad the batch only to the 8-row sublane granule (never to the tile size).
    B8 = _round_up(max(B, 1), 8)
    if B8 != B:
        x_in = jnp.zeros((B8, S), jnp.float32).at[:B, :].set(x)
    else:
        x_in = x.astype(jnp.float32)

    # Batch tile: multiple of 8; large enough to amortize grid-step overhead,
    # small enough that mid-size batches still get >= 2 grid steps for the
    # "parallel" (megacore) axis.  Blocks stay far below even v5e's 16 MiB
    # scoped-VMEM default at tb_max=1024.
    tb = max(8, min(tb_max, _round_up(pl.cdiv(B8, 2), 8), B8))
    grid = (pl.cdiv(B8, tb),)      # partial last block handled by Pallas

    # Advisory cost estimate with the real (un-padded-in-HBM) shapes.
    flops = B8 * (2 * S * Hp + 2 * Hp * A)
    bytes_accessed = 4 * (B8 * S + S * Hp + Hp + A * Hp + A + B8 * A)

    out = pl.pallas_call(
        policy_kernel,
        out_shape=jax.ShapeDtypeStruct((B8, A), jnp.float32),
        grid=grid,
        in_specs=[
            pl.BlockSpec((tb, S), lambda i: (i, 0)),    # x: tiled along batch
            pl.BlockSpec((S, Hp), lambda i: (0, 0)),    # w1: VMEM-resident
            pl.BlockSpec((1, Hp), lambda i: (0, 0)),    # b1: VMEM-resident
            pl.BlockSpec((A, Hp), lambda i: (0, 0)),    # w2 (transposed)
            pl.BlockSpec((1, A), lambda i: (0, 0)),     # b2
        ],
        out_specs=pl.BlockSpec((tb, A), lambda i: (i, 0)),
        compiler_params=pltpu.CompilerParams(
            dimension_semantics=("parallel",),          # megacore on v7x
        ),
        cost_estimate=pl.CostEstimate(
            flops=flops,
            transcendentals=B8 * (A + 1),
            bytes_accessed=bytes_accessed,
        ),
    )(x_in, w1_p, b1_p, w2t_p, b2_p)

    return out if B8 == B else out[:B, :]


def xavier_normal(key, fan_in, fan_out):
    std = (2.0 / (fan_in + fan_out)) ** 0.5
    # stored as (in, out): transpose of PyTorch's (out, in) nn.Linear.weight
    return std * jax.random.normal(key, (fan_in, fan_out), dtype=jnp.float32)


if __name__ == "__main__":
    state_dim, action_dim, hidden, batch = 4, 2, 10, 8

    key = jax.random.PRNGKey(0)
    kx, kw1, kw2 = jax.random.split(key, 3)

    x = jax.random.normal(kx, (batch, state_dim), dtype=jnp.float32)
    w1 = xavier_normal(kw1, state_dim, hidden)
    b1 = jnp.zeros((hidden,), dtype=jnp.float32)          # nn.init.constant_(bias, 0)
    w2 = xavier_normal(kw2, hidden, action_dim)
    b2 = jnp.zeros((action_dim,), dtype=jnp.float32)

    params = prepare_params(w1, b1, w2, b2)               # pad once at init

    fwd = jax.jit(lambda xx, pp: policy_forward(xx, pp))
    out = fwd(x, params)
    jax.block_until_ready(out)

    # reference check in plain JAX (un-padded weights)
    h_ref = jnp.maximum(x @ w1 + b1, 0.0)
    z_ref = h_ref @ w2 + b2
    ref = jax.nn.log_softmax(z_ref, axis=1)
    assert out.shape == (batch, action_dim)
    assert jnp.allclose(out, ref, atol=1e-5), "mismatch vs reference"

    print("KERNEL_OK")
</pallas_src>

<mosaic_0001>
module attributes {stable_mosaic.version = 11 : i64} {
  func.func @policy_kernel(%arg0: i32, %arg1: memref<8x4xf32, #tpu.memory_space<vmem>>, %arg2: memref<4x128xf32, #tpu.memory_space<vmem>>, %arg3: memref<1x128xf32, #tpu.memory_space<vmem>>, %arg4: memref<2x128xf32, #tpu.memory_space<vmem>>, %arg5: memref<1x2xf32, #tpu.memory_space<vmem>>, %arg6: memref<8x2xf32, #tpu.memory_space<vmem>>) attributes {dimension_semantics = [#tpu.dimension_semantics<parallel>], iteration_bounds = array<i64: 1>, scalar_prefetch = 0 : i64, scratch_operands = 0 : i64, tpu.core_type = #tpu.core_type<tc>, window_params = [{transform_indices = @transform_0, window_bounds = array<i64: 8, 4>}, {pipeline_mode = #tpu.pipeline_mode<synchronous>, transform_indices = @transform_1, window_bounds = array<i64: 4, 128>}, {pipeline_mode = #tpu.pipeline_mode<synchronous>, transform_indices = @transform_2, window_bounds = array<i64: 1, 128>}, {pipeline_mode = #tpu.pipeline_mode<synchronous>, transform_indices = @transform_3, window_bounds = array<i64: 2, 128>}, {pipeline_mode = #tpu.pipeline_mode<synchronous>, transform_indices = @transform_4, window_bounds = array<i64: 1, 2>}, {transform_indices = @transform_5, window_bounds = array<i64: 8, 2>}]} {
    %c0 = arith.constant 0 : index
    %c0_0 = arith.constant 0 : index
    %0 = vector.load %arg1[%c0, %c0_0] : memref<8x4xf32, #tpu.memory_space<vmem>>, vector<8x4xf32>
    %c0_1 = arith.constant 0 : index
    %c0_2 = arith.constant 0 : index
    %1 = vector.load %arg2[%c0_1, %c0_2] : memref<4x128xf32, #tpu.memory_space<vmem>>, vector<4x128xf32>
    %2 = vector.extract_strided_slice %0 {offsets = [0, 0], sizes = [8, 1], strides = [1, 1]} : vector<8x4xf32> to vector<8x1xf32>
    %3 = vector.extract_strided_slice %1 {offsets = [0, 0], sizes = [1, 128], strides = [1, 1]} : vector<4x128xf32> to vector<1x128xf32>
    %4 = vector.broadcast %2 : vector<8x1xf32> to vector<8x128xf32>
    %5 = vector.broadcast %3 : vector<1x128xf32> to vector<8x128xf32>
    %6 = arith.mulf %4, %5 : vector<8x128xf32>
    %7 = vector.extract_strided_slice %0 {offsets = [0, 1], sizes = [8, 1], strides = [1, 1]} : vector<8x4xf32> to vector<8x1xf32>
    %8 = vector.extract_strided_slice %1 {offsets = [1, 0], sizes = [1, 128], strides = [1, 1]} : vector<4x128xf32> to vector<1x128xf32>
    %9 = vector.broadcast %7 : vector<8x1xf32> to vector<8x128xf32>
    %10 = vector.broadcast %8 : vector<1x128xf32> to vector<8x128xf32>
    %11 = arith.mulf %9, %10 : vector<8x128xf32>
    %12 = arith.addf %6, %11 : vector<8x128xf32>
    %13 = vector.extract_strided_slice %0 {offsets = [0, 2], sizes = [8, 1], strides = [1, 1]} : vector<8x4xf32> to vector<8x1xf32>
    %14 = vector.extract_strided_slice %1 {offsets = [2, 0], sizes = [1, 128], strides = [1, 1]} : vector<4x128xf32> to vector<1x128xf32>
    %15 = vector.broadcast %13 : vector<8x1xf32> to vector<8x128xf32>
    %16 = vector.broadcast %14 : vector<1x128xf32> to vector<8x128xf32>
    %17 = arith.mulf %15, %16 : vector<8x128xf32>
    %18 = arith.addf %12, %17 : vector<8x128xf32>
    %19 = vector.extract_strided_slice %0 {offsets = [0, 3], sizes = [8, 1], strides = [1, 1]} : vector<8x4xf32> to vector<8x1xf32>
    %20 = vector.extract_strided_slice %1 {offsets = [3, 0], sizes = [1, 128], strides = [1, 1]} : vector<4x128xf32> to vector<1x128xf32>
    %21 = vector.broadcast %19 : vector<8x1xf32> to vector<8x128xf32>
    %22 = vector.broadcast %20 : vector<1x128xf32> to vector<8x128xf32>
    %23 = arith.mulf %21, %22 : vector<8x128xf32>
    %24 = arith.addf %18, %23 : vector<8x128xf32>
    %c0_3 = arith.constant 0 : index
    %c0_4 = arith.constant 0 : index
    %25 = vector.load %arg3[%c0_3, %c0_4] : memref<1x128xf32, #tpu.memory_space<vmem>>, vector<1x128xf32>
    %26 = vector.broadcast %25 : vector<1x128xf32> to vector<8x128xf32>
    %27 = arith.addf %24, %26 : vector<8x128xf32>
    %cst = arith.constant 0.000000e+00 : f32
    %28 = vector.broadcast %cst : f32 to vector<8x128xf32>
    %29 = arith.maximumf %27, %28 : vector<8x128xf32>
    %c0_5 = arith.constant 0 : index
    %c0_6 = arith.constant 0 : index
    %30 = vector.load %arg4[%c0_5, %c0_6] : memref<2x128xf32, #tpu.memory_space<vmem>>, vector<2x128xf32>
    %c0_7 = arith.constant 0 : index
    %c0_8 = arith.constant 0 : index
    %31 = vector.load %arg5[%c0_7, %c0_8] : memref<1x2xf32, #tpu.memory_space<vmem>>, vector<1x2xf32>
    %32 = vector.extract_strided_slice %30 {offsets = [0, 0], sizes = [1, 128], strides = [1, 1]} : vector<2x128xf32> to vector<1x128xf32>
    %33 = vector.broadcast %32 : vector<1x128xf32> to vector<8x128xf32>
    %34 = arith.mulf %29, %33 : vector<8x128xf32>
    %cst_9 = arith.constant dense<0.000000e+00> : vector<8xf32>
    %35 = vector.multi_reduction <add>, %34, %cst_9 [1] : vector<8x128xf32> to vector<8xf32>
    %36 = vector.shape_cast %35 : vector<8xf32> to vector<8x1xf32>
    %37 = vector.extract_strided_slice %31 {offsets = [0, 0], sizes = [1, 1], strides = [1, 1]} : vector<1x2xf32> to vector<1x1xf32>
    %38 = vector.broadcast %37 : vector<1x1xf32> to vector<8x1xf32>
    %39 = arith.addf %36, %38 : vector<8x1xf32>
    %40 = vector.extract_strided_slice %30 {offsets = [1, 0], sizes = [1, 128], strides = [1, 1]} : vector<2x128xf32> to vector<1x128xf32>
    %41 = vector.broadcast %40 : vector<1x128xf32> to vector<8x128xf32>
    %42 = arith.mulf %29, %41 : vector<8x128xf32>
    %cst_10 = arith.constant dense<0.000000e+00> : vector<8xf32>
    %43 = vector.multi_reduction <add>, %42, %cst_10 [1] : vector<8x128xf32> to vector<8xf32>
    %44 = vector.shape_cast %43 : vector<8xf32> to vector<8x1xf32>
    %45 = vector.extract_strided_slice %31 {offsets = [0, 1], sizes = [1, 1], strides = [1, 1]} : vector<1x2xf32> to vector<1x1xf32>
    %46 = vector.broadcast %45 : vector<1x1xf32> to vector<8x1xf32>
    %47 = arith.addf %44, %46 : vector<8x1xf32>
    %48 = arith.maximumf %39, %47 : vector<8x1xf32>
    %49 = arith.subf %39, %48 : vector<8x1xf32>
    %50 = math.exp %49 : vector<8x1xf32>
    %51 = arith.subf %47, %48 : vector<8x1xf32>
    %52 = math.exp %51 : vector<8x1xf32>
    %53 = arith.addf %50, %52 : vector<8x1xf32>
    %54 = math.log %53 : vector<8x1xf32>
    %55 = arith.addf %54, %48 : vector<8x1xf32>
    %56 = arith.subf %39, %55 : vector<8x1xf32>
    %c0_11 = arith.constant 0 : index
    %c0_12 = arith.constant 0 : index
    %57 = vector.load %arg6[%c0_11, %c0_12] : memref<8x2xf32, #tpu.memory_space<vmem>>, vector<8x1xf32>
    tpu.vector_store %arg6[%c0_11, %c0_12], %56 {strides = array<i32>} : memref<8x2xf32, #tpu.memory_space<vmem>>, vector<8x1xf32>,
    %58 = arith.subf %47, %55 : vector<8x1xf32>
    %c0_13 = arith.constant 0 : index
    %c1 = arith.constant 1 : index
    %59 = vector.load %arg6[%c0_13, %c1] : memref<8x2xf32, #tpu.memory_space<vmem>>, vector<8x1xf32>
    tpu.vector_store %arg6[%c0_13, %c1], %58 {strides = array<i32>} : memref<8x2xf32, #tpu.memory_space<vmem>>, vector<8x1xf32>,
    return
  }
  func.func @transform_0(%arg0: i32) -> (i32, i32) {
    %c0_i32 = arith.constant 0 : i32
    %c0_i32_0 = arith.constant 0 : i32
    return %arg0, %c0_i32 : i32, i32
  }
  func.func @transform_1(%arg0: i32) -> (i32, i32) {
    %c0_i32 = arith.constant 0 : i32
    %c0_i32_0 = arith.constant 0 : i32
    %c0_i32_1 = arith.constant 0 : i32
    return %c0_i32, %c0_i32_0 : i32, i32
  }
  func.func @transform_2(%arg0: i32) -> (i32, i32) {
    %c0_i32 = arith.constant 0 : i32
    %c0_i32_0 = arith.constant 0 : i32
    %c0_i32_1 = arith.constant 0 : i32
    return %c0_i32, %c0_i32_0 : i32, i32
  }
  func.func @transform_3(%arg0: i32) -> (i32, i32) {
    %c0_i32 = arith.constant 0 : i32
    %c0_i32_0 = arith.constant 0 : i32
    %c0_i32_1 = arith.constant 0 : i32
    return %c0_i32, %c0_i32_0 : i32, i32
  }
  func.func @transform_4(%arg0: i32) -> (i32, i32) {
    %c0_i32 = arith.constant 0 : i32
    %c0_i32_0 = arith.constant 0 : i32
    %c0_i32_1 = arith.constant 0 : i32
    return %c0_i32, %c0_i32_0 : i32, i32
  }
  func.func @transform_5(%arg0: i32) -> (i32, i32) {
    %c0_i32 = arith.constant 0 : i32
    %c0_i32_0 = arith.constant 0 : i32
    return %arg0, %c0_i32 : i32, i32
  }
}

</mosaic_0001>

<bundles_post_ra>
// kernel: _lambda_.1
= control target key start
LH: loop header
LB: loop body
LE: loop exit
PB: predicated region body
PF: predicated region fallthrough
CT: control target
= control target key end

     0   :  { %v151_v0 = vmov 0   ;;  %v152_v2 = vmov 2   ;;  %v153_v3 = vmov 1   ;;  %v154_v4 = vmov 3   ;;  %s208_s0 = inlined_call_operand.vmem [shape: f32[8,4], index: 0, kind: input, shape index: {}]   ;;  %s209_s1 = inlined_call_operand.vmem [shape: f32[4,128], index: 1, kind: input, shape index: {}]   ;;  %s210_s2 = inlined_call_operand.vmem [shape: f32[1,128], index: 2, kind: input, shape index: {}]   ;;  %s211_s3 = inlined_call_operand.vmem [shape: f32[2,128], index: 3, kind: input, shape index: {}]   ;;  %s212_s4 = inlined_call_operand.vmem [shape: f32[1,2], index: 4, kind: input, shape index: {}]   ;;  %s213_s5 = inlined_call_operand.vmem [shape: f32[8,2], index: 5, kind: output, shape index: {}]  }
   0x1   :  { %140 = vset.pattern.permute.xlu0 %v151_v0  ;;  %v20_v1 = vld [vmem:[%s208_s0] sm:$0xff]  ;;  %142 = vset.pattern.permute.xlu1 %v152_v2  ;;  %v27_v5 = vlaneseq  ;;  %vm119_vm0 = vcmask 7168   ;;  %vm126_vm1 = vcmask 15368  }
   0x2   :  { %24 = vperm.xlu0 %140, %v20_v1   ;;  %43 = vperm.xlu1 %142, %v20_v1   ;;  %v21_v9 = vld [vmem:[%s209_s1] sm:$0xf] }
   0x3   :  { %v28_v6 = vshrl.u32 %v27_v5, 7  ;;  %v132_v26 = vld [vmem:[%s210_s2] ss:$0 sm:$0xff]  ;;  %s155_s2 = smov 127  }
   0x4   :  { %v71_v27 = vld [vmem:[%s211_s3] sm:$0x3]  ;;  %s156_s3 = smov 1  }
   0x5   :  { %v29_v7 = vsub.s32 0, %v28_v6  ;;  %v38_v8 = vsub.s32 1, %v28_v6  ;;  %v48_v11 = vsub.s32 2, %v28_v6  ;;  %v58_v13 = vsub.s32 3, %v28_v6  ;;  %v133_v35 = vld [vmem:[%s212_s4] ss:$0 sm:$0xff] }
   0x6   :  { %141 = vset.pattern.permute.xlu0 %v153_v3  ;;  %143 = vset.pattern.permute.xlu1 %v154_v4 }
   0x7   :  { %33 = vperm.xlu0 %141, %v20_v1   ;;  %53 = vperm.xlu1 %143, %v20_v1   ;;  %v30_v14 = vrot.slane %v21_v9, %v29_v7  ;;  %v39_v15 = vrot.slane %v21_v9, %v38_v8  ;;  %v49_v16 = vrot.slane %v21_v9, %v48_v11 }
   0x8   :  { %v59_v17 = vrot.slane %v21_v9, %v58_v13  ;;  %v90_v30 = vrot.slane %v71_v27, %v38_v8  ;;  %v76_v31 = vrot.slane %v71_v27, %v29_v7 }
   0xb   :  { %144 = vset.pattern.permute.xlu0 %v154_v4 }
  0x81   :  { %v25_v10 = vpop.permute.xlu0 %24  ;;  %v44_v12 = vpop.permute.xlu1 %43 }
  0x82   :  { %v31_v20 = vmul.f32 %v30_v14, %v25_v10  ;;  %v50_v22 = vmul.f32 %v49_v16, %v44_v12 }
  0x86   :  { %v34_v18 = vpop.permute.xlu0 %33  ;;  %v54_v19 = vpop.permute.xlu1 %53 }
  0x87   :  { %v40_v21 = vmul.f32 %v39_v15, %v34_v18  ;;  %v60_v24 = vmul.f32 %v59_v17, %v54_v19 }
  0x89   :  { %v41_v23 = vadd.f32 %v40_v21, %v31_v20 }
  0x8b   :  { %v51_v25 = vadd.f32 %v50_v22, %v41_v23 }
  0x8d   :  { %v61_v28 = vadd.f32 %v60_v24, %v51_v25 }
  0x8f   :  { %v69_v29 = vadd.f32 %v132_v26, %v61_v28 }
  0x91   :  { %v70_v32 = vmax.f32 %v69_v29, 0.0 }
  0x93   :  { %v91_v33 = vmul.f32 %v90_v30, %v70_v32  ;;  %v77_v34 = vmul.f32 %v76_v31, %v70_v32 }
  0x95   :  { %92 = vadd.xlane.f32.xlu1 %v91_v33  ;;  %78 = vadd.xlane.f32.xlu0 %v77_v34 }
 0x122   :  { %v93_v36 = vpop.xlane.xlu1 %92  ;;  %v79_v38 = vpop.xlane.xlu0 %78 }
 0x123   :  { %v94_v37 = vadd.f32 %v133_v35, %v93_v36  ;;  %v86_v39 = vadd.f32 %v133_v35, %v79_v38 }
 0x125   :  { %96 = vrot.lane.b32.xlu0 %v94_v37, %s155_s2 }
 0x197   :  { %v97_v40 = vpop.permute.xlu0 %96 }
 0x198   :  { %v99_v41 = vmax.f32 %v86_v39, %v97_v40 }
 0x19a   :  { %104 = vrot.lane.b32.xlu1 %v99_v41, %s156_s3  ;;  %v100_v46 = vsub.f32 %v86_v39, %v99_v41 }
 0x19c   :  { %v101_v47 = vmul.f32 1.442695, %v100_v46 }
 0x20c   :  { %v105_v42 = vpop.permute.xlu1 %104 }
 0x20d   :  { %v107_v43 = vsub.f32 %v94_v37, %v105_v42 }
 0x20f   :  { %v108_v44 = vmul.f32 1.442695, %v107_v43 }
 0x211   :  { %145 = vpow2.f32 %v108_v44 }
 0x212   :  { %147 = vpow2.f32 %v101_v47 }
 0x21b   :  { %v146_v45 = vpop.eup %145 }
 0x21c   :  { %111 = vrot.lane.b32.xlu1 %v146_v45, %s155_s2  ;;  %v148_v48 = vpop.eup %147 }
 0x28e   :  { %v112_v49 = vpop.permute.xlu1 %111 }
 0x28f   :  { %v114_v50 = vadd.f32 %v148_v48, %v112_v49 }
 0x291   :  { %149 = vlog2.f32 %v114_v50 }
 0x29b   :  { %v150_v51 = vpop.eup %149 }
 0x29c   :  { %v116_v52 = vmul.f32 0.6931472, %v150_v51 }
 0x29e   :  { %v117_v53 = vadd.f32 %v116_v52, %v99_v41 }
 0x2a0   :  { %122 = vrot.lane.b32.xlu0 %v117_v53, %s156_s3  ;;  %v118_v54 = vsub.f32 %v86_v39, %v117_v53 }
 0x2a2   :  { %120 = vst.msk [vmem:[%s213_s5] sm:$0xff] %vm119_vm0, %v118_v54 }
 0x312   :  { %v123_v55 = vpop.permute.xlu0 %122 }
 0x313   :  { %v125_v56 = vsub.f32 %v94_v37, %v123_v55 }
 0x315   :  { %127 = vst.msk [vmem:[%s213_s5] sm:$0xff] %vm126_vm1, %v125_v56 }

</bundles_post_ra>
